<compile_context>
chip_gen: v7x
topology: tpu7x:2x2x1
jax: 0.10.0
libtpu: 0.0.40
codegen_flags: <defaults>
</compile_context>

<pallas_src>
import jax
import jax.numpy as jnp
from jax.experimental import pallas as pl
from jax.experimental.pallas import tpu as pltpu

LANES = 128
SUBLANES = 8

P_DROP = 0.5
SCALE = 1.0 / (1.0 - P_DROP)                           # = 2.0
# keep  <=>  uniform_u32 < threshold ; keep prob = (1 - p) = 2**31 / 2**32 exactly.
KEEP_THRESHOLD_U32 = int(round((1.0 - P_DROP) * (1 << 32)))   # = 2**31
DROPOUT_SALT = 0x64726F70                              # "drop": decorrelates mask stream
MAX_TILE_ROWS = 2048                                   # 2048*128*4B = 1 MiB per block/stream


# ----------------------------------------------------------------------------
# Kernels
# ----------------------------------------------------------------------------
def _relu_dropout_prng_kernel(x_ref, seed_ref, o_ref):
    """Fused ReLU + dropout; bits generated in-kernel (real-TPU path)."""
    # Independent stream per grid step so every tile gets fresh bits.
    pltpu.prng_seed(seed_ref[0], pl.program_id(0))
    raw = pltpu.prng_random_bits(x_ref.shape)
    bits = raw if raw.dtype == jnp.uint32 else pltpu.bitcast(raw, jnp.uint32)

    x = x_ref[...]
    keep = (bits < jnp.uint32(KEEP_THRESHOLD_U32)) & (x > jnp.float32(0.0))
    # where(keep, relu(x)/(1-p), 0) == where(keep & (x>0), 2*x, 0)
    o_ref[...] = jnp.where(keep, x * jnp.float32(SCALE), jnp.float32(0.0))


def _relu_dropout_bits_kernel(x_ref, bits_ref, o_ref):
    """Fused ReLU + dropout; bits precomputed on the host (interpret fallback)."""
    x = x_ref[...]
    bits = bits_ref[...]
    keep = (bits < jnp.uint32(KEEP_THRESHOLD_U32)) & (x > jnp.float32(0.0))
    o_ref[...] = jnp.where(keep, x * jnp.float32(SCALE), jnp.float32(0.0))


# ----------------------------------------------------------------------------
# pallas_call wrappers
# ----------------------------------------------------------------------------
def _grid_and_tile(rows):
    tile_r = min(rows, MAX_TILE_ROWS)          # rows is a multiple of 8 (padded)
    return (pl.cdiv(rows, tile_r),), tile_r


def _call_prng(x2d, seed):
    (grid, tile_r) = _grid_and_tile(x2d.shape[0])
    r, c = x2d.shape
    seed_arr = jnp.asarray([seed], dtype=jnp.int32)
    return pl.pallas_call(
        _relu_dropout_prng_kernel,
        out_shape=jax.ShapeDtypeStruct((r, c), x2d.dtype),
        grid=grid,
        in_specs=[
            pl.BlockSpec((tile_r, c), lambda i: (i, 0)),
            pl.BlockSpec(memory_space=pltpu.MemorySpace.SMEM),
        ],
        out_specs=pl.BlockSpec((tile_r, c), lambda i: (i, 0)),
        input_output_aliases={0: 0},           # in-place ReLU semantics
        compiler_params=pltpu.CompilerParams(
            dimension_semantics=("parallel",),
        ),
    )(x2d, seed_arr)


def _call_hostbits(x2d, seed):
    (grid, tile_r) = _grid_and_tile(x2d.shape[0])
    r, c = x2d.shape
    key = jax.random.fold_in(jax.random.PRNGKey(seed), DROPOUT_SALT)
    bits = jax.random.bits(key, (r, c), jnp.uint32)
    return pl.pallas_call(
        _relu_dropout_bits_kernel,
        out_shape=jax.ShapeDtypeStruct((r, c), x2d.dtype),
        grid=grid,
        in_specs=[
            pl.BlockSpec((tile_r, c), lambda i: (i, 0)),
            pl.BlockSpec((tile_r, c), lambda i: (i, 0)),
        ],
        out_specs=pl.BlockSpec((tile_r, c), lambda i: (i, 0)),
        compiler_params=pltpu.CompilerParams(
            dimension_semantics=("parallel",),
        ),
    )(x2d, bits)


def _as_lane_dense(x):
    """Flatten, zero-pad to a multiple of 8*128, reshape to (R, 128)."""
    total = x.size
    pad = (-total) % (SUBLANES * LANES)
    flat = x.reshape(-1)
    if pad:
        flat = jnp.pad(flat, (0, pad))         # pads with 0; relu+dropout(0) == 0
    return flat.reshape((total + pad) // LANES, LANES)


def relu_dropout(x: jax.Array, seed: int = 0) -> jax.Array:
    """ReLU followed by Dropout(p=0.5) in training mode (output scaled by 1/(1-p)).

    NOTE: pass a fresh `seed` every training step; reusing the seed reuses the
    dropout mask.
    """
    total = x.size
    if jax.default_backend() == "tpu":
        try:
            out2d = jax.block_until_ready(_call_prng(_as_lane_dense(x), seed))
        except Exception:
            # TPU interpret mode (no prng_* lowering) or other lowering failure:
            # rebuild the operand from `x` and use precomputed host bits.
            out2d = _call_hostbits(_as_lane_dense(x), seed)
    else:
        out2d = _call_hostbits(_as_lane_dense(x), seed)

    return out2d.reshape(-1)[:total].reshape(x.shape)


# ----------------------------------------------------------------------------
# Demo / sanity checks
# ----------------------------------------------------------------------------
if __name__ == "__main__":
    root = jax.random.PRNGKey(0)
    x_key, _ = jax.random.split(root)          # input key != dropout key (see header)
    # Shape from the module's forward: x41 is (1, 4096).
    x = jax.random.normal(x_key, (1, 4096), dtype=jnp.float32)

    out = relu_dropout(x, seed=0)
    out = jax.block_until_ready(out)

    # Sanity checks:
    #  - output is never negative (ReLU),
    #  - every nonzero output equals 2 * relu(x) (keep scale 1/(1-0.5)),
    #  - output is zero wherever x <= 0,
    #  - keep fraction among strictly-positive inputs is ~0.5.
    relu_x = jnp.maximum(x, 0.0)
    nonzero = out != 0.0
    assert out.shape == (1, 4096)
    assert bool(jnp.all(out >= 0.0))
    assert bool(jnp.all(jnp.where(nonzero, jnp.abs(out - 2.0 * relu_x) < 1e-6, True)))
    assert bool(jnp.all(jnp.where(x <= 0.0, out == 0.0, True)))

    pos = x > 0.0
    keep_frac = jnp.sum(nonzero & pos) / jnp.maximum(jnp.sum(pos), 1)
    assert 0.35 < float(keep_frac) < 0.65, f"keep fraction off: {float(keep_frac)}"

    print("KERNEL_OK")
</pallas_src>

<mosaic_0001>
module attributes {stable_mosaic.version = 11 : i64} {
  func.func @_relu_dropout_bits_kernel(%arg0: i32, %arg1: memref<32x128xf32, #tpu.memory_space<vmem>>, %arg2: memref<32x128xi32, #tpu.memory_space<vmem>>, %arg3: memref<32x128xf32, #tpu.memory_space<vmem>>) attributes {dimension_semantics = [#tpu.dimension_semantics<parallel>], iteration_bounds = array<i64: 1>, scalar_prefetch = 0 : i64, scratch_operands = 0 : i64, tpu.core_type = #tpu.core_type<tc>, window_params = [{transform_indices = @transform_0, window_bounds = array<i64: 32, 128>}, {transform_indices = @transform_1, window_bounds = array<i64: 32, 128>}, {transform_indices = @transform_2, window_bounds = array<i64: 32, 128>}]} {
    %c0 = arith.constant 0 : index
    %c0_0 = arith.constant 0 : index
    %0 = vector.load %arg1[%c0, %c0_0] : memref<32x128xf32, #tpu.memory_space<vmem>>, vector<32x128xf32>
    %c0_1 = arith.constant 0 : index
    %c0_2 = arith.constant 0 : index
    %1 = vector.load %arg2[%c0_1, %c0_2] : memref<32x128xi32, #tpu.memory_space<vmem>>, vector<32x128xi32>
    %c-2147483648_i32 = arith.constant -2147483648 : i32
    %2 = vector.broadcast %c-2147483648_i32 : i32 to vector<32x128xi32>
    %3 = arith.cmpi ult, %1, %2 : vector<32x128xi32>
    %cst = arith.constant 0.000000e+00 : f32
    %4 = vector.broadcast %cst : f32 to vector<32x128xf32>
    %5 = arith.cmpf ogt, %0, %4 : vector<32x128xf32>
    %6 = arith.andi %3, %5 : vector<32x128xi1>
    %cst_3 = arith.constant 2.000000e+00 : f32
    %7 = vector.broadcast %cst_3 : f32 to vector<32x128xf32>
    %8 = arith.mulf %0, %7 : vector<32x128xf32>
    %cst_4 = arith.constant 0.000000e+00 : f32
    %9 = vector.broadcast %cst_4 : f32 to vector<32x128xf32>
    %10 = arith.select %6, %8, %9 : vector<32x128xi1>, vector<32x128xf32>
    %c0_5 = arith.constant 0 : index
    %c0_6 = arith.constant 0 : index
    %11 = vector.load %arg3[%c0_5, %c0_6] : memref<32x128xf32, #tpu.memory_space<vmem>>, vector<32x128xf32>
    tpu.vector_store %arg3[%c0_5, %c0_6], %10 {strides = array<i32>} : memref<32x128xf32, #tpu.memory_space<vmem>>, vector<32x128xf32>,
    return
  }
  func.func @transform_0(%arg0: i32) -> (i32, i32) {
    %c0_i32 = arith.constant 0 : i32
    %c0_i32_0 = arith.constant 0 : i32
    return %arg0, %c0_i32 : i32, i32
  }
  func.func @transform_1(%arg0: i32) -> (i32, i32) {
    %c0_i32 = arith.constant 0 : i32
    %c0_i32_0 = arith.constant 0 : i32
    return %arg0, %c0_i32 : i32, i32
  }
  func.func @transform_2(%arg0: i32) -> (i32, i32) {
    %c0_i32 = arith.constant 0 : i32
    %c0_i32_0 = arith.constant 0 : i32
    return %arg0, %c0_i32 : i32, i32
  }
}

</mosaic_0001>

<bundles_post_ra>
// kernel: tpu_custom_call.1
= control target key start
LH: loop header
LB: loop body
LE: loop exit
PB: predicated region body
PF: predicated region fallthrough
CT: control target
= control target key end

     0   :  { %7 = vsyncpa [#allocation3], 0  ;;  %s232_s0 = inlined_call_operand.hbm [shape: f32[32,128], index: 0, kind: input, shape index: {}]   ;;  %s233_s1 = inlined_call_operand.hbm [shape: u32[32,128], index: 1, kind: input, shape index: {}]   ;;  %s234_s2 = inlined_call_operand.hbm [shape: f32[32,128], index: 2, kind: output, shape index: {}]  }
   0x1   :  { %8 = vsyncpa [#allocation6], 0 }
   0x2   :  { %9 = vsyncpa [#allocation4], 0  ;;  %s167_s9 = smov [#allocation2]   ;;  %s95_s13 = scalar_lea.hbm %s232_s0, 512 }
   0x3   :  { %s15_s10 = sshll.u32 %s167_s9, 4  ;;  %p96_p0 = scmp.ne.s32.totalorder %s232_s0, %s95_s13  ;;  %s16_s10 = int_to_ptr.vmem [resolvable:$true] %s15_s10 }
   0x4   :  { %p99_p1 = scmp.lt.u32.totalorder %s95_s13, %s232_s0 }
   0x6   :  { %p101_p2 = pnand %p99_p1, %p96_p0 }
   0x8   :  { %104 = shalt.err (!%p101_p2)
}
   0x9   :  { %s105_s18 = scalar_lea.vmem %s16_s10, 512  ;;  %p110_p4 = scmp.lt.s32.totalorder %s16_s10, %s16_s10 }
   0xa   :  { %p106_p3 = scmp.ne.s32.totalorder %s16_s10, %s105_s18  ;;  %p111_p5 = scmp.lt.s32.totalorder %s105_s18, %s105_s18 }
   0xc   :  { %p112_p6 = por %p111_p5, %p110_p4 }
   0xe   :  { %p113_p7 = pnand %p112_p6, %p106_p3 }
  0x10   :  { %116 = shalt.err (!%p113_p7)
}
  0x11   :  { %s168_s19 = smov 128   ;;  %s169_s20 = smov 8  }
  0x12   :  { %21 = dma.hbm_to_vmem [thread:$0]  %s232_s0, 512, %s16_s10, [#allocation3], %s168_s19, %s168_s19, %s169_s20  }
  0x13   :  { %s170_s23 = smov [#allocation5]   ;;  %s117_s27 = scalar_lea.hbm %s233_s1, 512 }
  0x14   :  { %s27_s24 = sshll.u32 %s170_s23, 4  ;;  %p118_p8 = scmp.ne.s32.totalorder %s233_s1, %s117_s27  ;;  %s28_s24 = int_to_ptr.vmem [resolvable:$true] %s27_s24 }
  0x15   :  { %p121_p9 = scmp.lt.u32.totalorder %s117_s27, %s233_s1 }
  0x17   :  { %p123_p10 = pnand %p121_p9, %p118_p8 }
  0x19   :  { %126 = shalt.err (!%p123_p10)
}
  0x1a   :  { %s127_s4 = scalar_lea.vmem %s28_s24, 512  ;;  %p132_p12 = scmp.lt.s32.totalorder %s28_s24, %s28_s24 }
  0x1b   :  { %p128_p11 = scmp.ne.s32.totalorder %s28_s24, %s127_s4  ;;  %p133_p13 = scmp.lt.s32.totalorder %s127_s4, %s127_s4 }
  0x1d   :  { %p134_p0 = por %p133_p13, %p132_p12 }
  0x1f   :  { %p135_p1 = pnand %p134_p0, %p128_p11 }
  0x21   :  { %138 = shalt.err (!%p135_p1)
}
  0x22   :  { %33 = dma.hbm_to_vmem [thread:$0]  %s233_s1, 512, %s28_s24, [#allocation6], %s168_s19, %s168_s19, %s169_s20  }
  0x23   :  { %161 = dma.done.wait [#allocation3], 512  }
  0x24   :  { %162 = vsyncadd [#allocation3], 4294966784 }
  0x25   :  { %163 = dma.done.wait [#allocation6], 512  }
  0x26   :  { %164 = vsyncadd [#allocation6], 4294966784  ;;  %v40_v0 = vld [vmem:[#allocation2] sm:$0xff]  ;;  %v41_v2 = vld [vmem:[#allocation2 + $0x8] sm:$0xff]  ;;  %s171_s6 = smov [#allocation7]  }
  0x27   :  { %v44_v1 = vld [vmem:[#allocation5] sm:$0xff]  ;;  %s77_s7 = sshll.u32 %s171_s6, 4  ;;  %vm52_vm1 = vcmp.gt.f32.partialorder %v40_v0, 0.0  ;;  %v60_v3 = vmul.f32 2.0, %v40_v0  ;;  %v45_v4 = vld [vmem:[#allocation5 + $0x8] sm:$0xff]  ;;  %vm53_vm2 = vcmp.gt.f32.partialorder %v41_v2, 0.0  ;;  %s78_s7 = int_to_ptr.vmem [resolvable:$true] %s77_s7 }
  0x28   :  { %vm48_vm0 = vcmp.lt.u32.totalorder %v44_v1, 2147483648  ;;  %v42_v5 = vld [vmem:[#allocation2 + $0x10] sm:$0xff]  ;;  %vm49_vm4 = vcmp.lt.u32.totalorder %v45_v4, 2147483648  ;;  %v61_v6 = vmul.f32 2.0, %v41_v2  ;;  %v43_v9 = vld [vmem:[#allocation2 + $0x18] sm:$0xff]  ;;  %s139_s1 = scalar_lea.vmem %s78_s7, 512  ;;  %p144_p3 = scmp.lt.s32.totalorder %s78_s7, %s78_s7 }
  0x29   :  { %vm56_vm3 = vmand %vm48_vm0, %vm52_vm1  ;;  %v46_v7 = vld [vmem:[#allocation5 + $0x10] sm:$0xff]  ;;  %vm54_vm5 = vcmp.gt.f32.partialorder %v42_v5, 0.0  ;;  %v62_v8 = vmul.f32 2.0, %v42_v5  ;;  %v47_v11 = vld [vmem:[#allocation5 + $0x18] sm:$0xff]  ;;  %vm55_vm8 = vcmp.gt.f32.partialorder %v43_v9, 0.0  ;;  %v63_v12 = vmul.f32 2.0, %v43_v9  ;;  %p140_p2 = scmp.ne.s32.totalorder %s78_s7, %s139_s1  ;;  %p145_p4 = scmp.lt.s32.totalorder %s139_s1, %s139_s1 }
  0x2a   :  { %v64_v10 = vsel %vm56_vm3, %v60_v3, 0.0  ;;  %vm57_vm6 = vmand %vm49_vm4, %vm53_vm2  ;;  %vm50_vm7 = vcmp.lt.u32.totalorder %v46_v7, 2147483648  ;;  %vm51_vm10 = vcmp.lt.u32.totalorder %v47_v11, 2147483648 }
  0x2b   :  { %68 = vst [vmem:[#allocation7] sm:$0xff] %v64_v10  ;;  %v65_v13 = vsel %vm57_vm6, %v61_v6, 0.0  ;;  %vm58_vm9 = vmand %vm50_vm7, %vm54_vm5  ;;  %p146_p5 = por %p145_p4, %p144_p3 }
  0x2c   :  { %69 = vst [vmem:[#allocation7 + $0x8] sm:$0xff] %v65_v13  ;;  %v66_v14 = vsel %vm58_vm9, %v62_v8, 0.0  ;;  %vm59_vm11 = vmand %vm51_vm10, %vm55_vm8 }
  0x2d   :  { %70 = vst [vmem:[#allocation7 + $0x10] sm:$0xff] %v66_v14  ;;  %v67_v15 = vsel %vm59_vm11, %v63_v12, 0.0  ;;  %p147_p6 = pnand %p146_p5, %p140_p2 }
  0x2e   :  { %71 = vst [vmem:[#allocation7 + $0x18] sm:$0xff] %v67_v15 }
  0x2f   :  { %150 = shalt.err (!%p147_p6)
}
  0x30   :  { %s151_s10 = scalar_lea.hbm %s234_s2, 512 }
  0x31   :  { %p152_p7 = scmp.ne.s32.totalorder %s234_s2, %s151_s10  ;;  %p155_p8 = scmp.lt.u32.totalorder %s151_s10, %s234_s2 }
  0x33   :  { %p157_p9 = pnand %p155_p8, %p152_p7 }
  0x35   :  { %160 = shalt.err (!%p157_p9)
}
  0x36   :  { %83 = dma.vmem_to_hbm [thread:$0]  %s78_s7, 512, %s234_s2, [#allocation4], %s168_s19, %s168_s19, %s169_s20  }
  0x37   :  { %165 = dma.done.wait [#allocation4], 512  }
  0x38   :  { %166 = vsyncadd [#allocation4], 4294966784 }
  0x39   :  { %87 = vsyncpa [#allocation3], 1 }
  0x3a   :  { %88 = vsyncpa [#allocation6], 1 }
  0x3b   :  { %89 = vsyncpa [#allocation4], 1 }

</bundles_post_ra>
